<compile_context>
chip_gen: v7x
topology: tpu7x:2x2x1
jax: 0.10.0
libtpu: 0.0.40
codegen_flags: <defaults>
</compile_context>

<pallas_src>
import functools

import jax
import jax.numpy as jnp
from jax.experimental import pallas as pl
from jax.experimental.pallas import tpu as pltpu

LANE = 128            # lane width: lane-dense fc3 / output granularity
MULTI_TILE = 1024     # row granularity when the batch spans more than one tile
VMEM_BUDGET = 40 << 20  # per-tile working-set target (scoped limit is 48 MiB)


def _round_up(x, m):
    return (x + m - 1) // m * m


def _cdiv(a, b):
    return -(-a // b)


def _critic_kernel(state_ref, action_ref,
                   w1_ref, b1_ref,
                   w2x_ref, w2a_ref, b2_ref,
                   w3_ref, b3_ref,
                   out_ref):
    wdt = w1_ref.dtype  # matmul compute dtype (bf16)

    # fc1 + relu.  Cast the streamed f32 rows to bf16 here, on data already in
    # VMEM (cheap VPU pack), instead of a separate XLA cast pass over HBM.
    x = jnp.dot(state_ref[...].astype(wdt), w1_ref[...],
                preferred_element_type=jnp.float32)
    x = jnp.maximum(x + b1_ref[...], 0.0)

    # fc2 on concat([x, action]) == x @ W2_x + action @ W2_a, then relu.
    h = jnp.dot(x.astype(wdt), w2x_ref[...], preferred_element_type=jnp.float32)
    h = h + jnp.dot(action_ref[...].astype(wdt), w2a_ref[...],
                    preferred_element_type=jnp.float32)
    h = jnp.maximum(h + b2_ref[...], 0.0)

    # fc3 (h1 -> 1), emitted lane-dense (batch on the 128-lane axis):
    # weight the h1 columns, view the tile as (tb/128, 128, h1), transpose each
    # (128, h1) block (XLU; h1 is a multiple of 128 so blocks are tile-aligned),
    # then reduce over the now-sublane h1 axis.  The result (tb/128, 128) keeps
    # batch on lanes, so the store + output DMA are dense instead of
    # one-valid-lane masked stores / strided 4-byte DMA granules.
    hw = h * w3_ref[...]                                   # (tb, h1)
    tb, h1 = hw.shape
    hw = hw.reshape(tb // LANE, LANE, h1)
    hwt = jnp.swapaxes(hw, 1, 2)                           # (tb/128, h1, 128)
    q = jnp.sum(hwt, axis=1) + b3_ref[0, 0]                # (tb/128, 128)
    out_ref[...] = q.astype(out_ref.dtype)


def _choose_tile(batch, tile_b, num_states, action_dim, h1):
    """Rows per grid step: multiple of 128 (lane-dense fc3/output), multiple of
    1024 when multi-tile (keeps the (tb/128, 128) output block 8-sublane aligned),
    exactly 2 tiles for mid-sized batches (v7x megacore), capped by VMEM budget."""
    # Rough f32 bytes of VMEM per batch row (activation temporaries + 2x-buffered
    # streamed inputs + output), used to cap the tile for v5e/v6e/v7x alike.
    per_row = 24 * h1 + 12 * (num_states + action_dim) + 16
    cap = max(MULTI_TILE, (VMEM_BUDGET // per_row) // MULTI_TILE * MULTI_TILE)
    tile_b = min(max(tile_b, LANE), cap)
    if batch <= tile_b:
        if batch > 2 * MULTI_TILE:
            tb = _round_up(_cdiv(batch, 2), MULTI_TILE)   # exactly 2 tiles
        else:
            tb = _round_up(batch, LANE)                   # single (small) tile
    else:
        tb = _round_up(min(tile_b, batch), MULTI_TILE)
    return tb, _cdiv(batch, tb)


@functools.partial(jax.jit, static_argnames=("tile_b",))
def critic_forward(state, action, params, *, tile_b=8192):
    w1, b1, w2x, w2a, b2, w3, b3 = params
    B, num_states = state.shape
    action_dim = action.shape[1]
    h1 = w1.shape[1]  # padded to a multiple of 128 by init_critic_params
    assert h1 % LANE == 0, "pad h1 to a multiple of 128 (see init_critic_params)"

    tb, nb = _choose_tile(B, tile_b, num_states, action_dim, h1)

    if B < tb:
        # Whole batch fits in (less than) one tile: pad the tiny inputs so the
        # block never exceeds the array.  Cost is <= tb rows -> negligible.
        state = jnp.pad(state, ((0, tb - B), (0, 0)))
        action = jnp.pad(action, ((0, tb - B), (0, 0)))
    # else: B >= tb.  A ragged last block is handled by Pallas' masking; OOB rows
    # hold unspecified values but only feed output rows that are sliced away
    # below (there is no cross-batch reduction), so no full-array jnp.pad pass.

    grid_spec = pltpu.PrefetchScalarGridSpec(
        num_scalar_prefetch=0,
        grid=(nb,),
        in_specs=[
            pl.BlockSpec((tb, num_states), lambda i: (i, 0)),   # state rows (pipelined, f32)
            pl.BlockSpec((tb, action_dim), lambda i: (i, 0)),   # action rows (pipelined, f32)
            pl.BlockSpec((num_states, h1), lambda i: (0, 0)),   # w1 (VMEM resident)
            pl.BlockSpec((1, h1), lambda i: (0, 0)),            # b1
            pl.BlockSpec((h1, h1), lambda i: (0, 0)),           # w2x
            pl.BlockSpec((action_dim, h1), lambda i: (0, 0)),   # w2a
            pl.BlockSpec((1, h1), lambda i: (0, 0)),            # b2
            pl.BlockSpec((1, h1), lambda i: (0, 0)),            # w3 row (f32)
            pl.BlockSpec(memory_space=pltpu.MemorySpace.SMEM),  # b3 scalar
        ],
        # Lane-dense (and sublane-dense) output block: batch rows mapped to
        # (tb/128 sublanes, 128 lanes) per grid step.
        out_specs=pl.BlockSpec((tb // LANE, LANE), lambda i: (i, 0)),
    )

    flops = 2 * nb * tb * (num_states * h1 + (h1 + action_dim) * h1 + h1)
    bytes_accessed = int(
        state.size * state.dtype.itemsize
        + action.size * action.dtype.itemsize
        + sum(p.size * p.dtype.itemsize for p in params)
        + nb * tb * 4)

    q = pl.pallas_call(
        _critic_kernel,
        out_shape=jax.ShapeDtypeStruct((nb * (tb // LANE), LANE), jnp.float32),
        grid_spec=grid_spec,
        compiler_params=pltpu.CompilerParams(
            dimension_semantics=("parallel",),        # megacore sharding on v7x
            vmem_limit_bytes=48 * 1024 * 1024),       # > v5e 16 MiB default, < v7x 64 MiB physical
        cost_estimate=pl.CostEstimate(
            flops=flops, transcendentals=0, bytes_accessed=bytes_accessed),
    )(state, action, w1, b1, w2x, w2a, b2, w3, b3)

    # Row-major flatten puts the lane-dense q values back in batch order.
    return q.reshape(-1)[:B].reshape(B, 1)


def init_critic_params(key, num_states, action_dim, h1_nodes,
                       weight_dtype=jnp.bfloat16):
    """PyTorch nn.Linear-style init (uniform +-1/sqrt(fan_in)).

    The hidden width is zero-padded to a multiple of 128 (exact: padded hidden
    units are 0 through both ReLUs and padded w3 entries are 0, so they never
    contribute).  Matmul weights are bf16 (MXU compute dtype); biases and the
    fc3 row stay f32 (used in f32 VPU math).
    """
    h1p = _round_up(h1_nodes, LANE)
    ks = jax.random.split(key, 6)

    def uni(k, shape, fan_in):
        bound = float(fan_in) ** -0.5
        return jax.random.uniform(k, shape, jnp.float32, -bound, bound)

    def pad_cols(x):
        return jnp.pad(x, ((0, 0), (0, h1p - x.shape[1])))

    # fc1: num_states -> h1
    w1 = pad_cols(uni(ks[0], (num_states, h1_nodes), num_states)).astype(weight_dtype)
    b1 = pad_cols(uni(ks[1], (1, h1_nodes), num_states))
    # fc2: (h1 + action_dim) -> h1, split into the x part and the action part
    fan2 = h1_nodes + action_dim
    w2_full = uni(ks[2], (fan2, h1_nodes), fan2)
    w2x = jnp.pad(w2_full[:h1_nodes],
                  ((0, h1p - h1_nodes), (0, h1p - h1_nodes))).astype(weight_dtype)
    w2a = pad_cols(w2_full[h1_nodes:]).astype(weight_dtype)
    b2 = pad_cols(uni(ks[3], (1, h1_nodes), fan2))
    # fc3: h1 -> 1, stored as a row vector for the in-kernel reduction
    w3 = pad_cols(uni(ks[4], (1, h1_nodes), h1_nodes))
    b3 = uni(ks[5], (1, 1), h1_nodes)
    return (w1, b1, w2x, w2a, b2, w3, b3)


def critic_forward_ref(state, action, params):
    """Pure-JAX reference mirroring the kernel's bf16/f32 mixed precision."""
    w1, b1, w2x, w2a, b2, w3, b3 = params
    s = state.astype(w1.dtype)
    a = action.astype(w2a.dtype)
    x = jnp.maximum(jnp.dot(s, w1, preferred_element_type=jnp.float32) + b1, 0.0)
    h = (jnp.dot(x.astype(w2x.dtype), w2x, preferred_element_type=jnp.float32)
         + jnp.dot(a, w2a, preferred_element_type=jnp.float32))
    h = jnp.maximum(h + b2, 0.0)
    return jnp.sum(h * w3, axis=-1, keepdims=True) + b3


if __name__ == "__main__":
    num_states, action_dim, h1_nodes, batch = 16, 4, 32, 8

    key = jax.random.PRNGKey(0)
    k_state, k_action, k_params, k_state2, k_action2 = jax.random.split(key, 5)

    state = jax.random.normal(k_state, (batch, num_states), jnp.float32)
    action = jax.random.normal(k_action, (batch, action_dim), jnp.float32)
    params = init_critic_params(k_params, num_states, action_dim, h1_nodes)

    out = critic_forward(state, action, params)
    jax.block_until_ready(out)
    ref = critic_forward_ref(state, action, params)
    assert out.shape == (batch, 1), out.shape
    assert jnp.allclose(out, ref, atol=1e-3, rtol=1e-3), (out, ref)

    # Multi-tile path: grid > 1, ragged (unpadded) last block, parallel batch axis.
    batch2 = 3000
    state2 = jax.random.normal(k_state2, (batch2, num_states), jnp.float32)
    action2 = jax.random.normal(k_action2, (batch2, action_dim), jnp.float32)
    out2 = critic_forward(state2, action2, params, tile_b=1024)
    jax.block_until_ready(out2)
    ref2 = critic_forward_ref(state2, action2, params)
    assert out2.shape == (batch2, 1), out2.shape
    assert jnp.allclose(out2, ref2, atol=1e-3, rtol=1e-3), (out2, ref2)

    print("KERNEL_OK")
</pallas_src>

<mosaic_0001>
module attributes {stable_mosaic.version = 11 : i64} {
  func.func @_critic_kernel(%arg0: i32, %arg1: memref<128x16xf32, #tpu.memory_space<vmem>>, %arg2: memref<128x4xf32, #tpu.memory_space<vmem>>, %arg3: memref<16x128xbf16, #tpu.memory_space<vmem>>, %arg4: memref<1x128xf32, #tpu.memory_space<vmem>>, %arg5: memref<128x128xbf16, #tpu.memory_space<vmem>>, %arg6: memref<4x128xbf16, #tpu.memory_space<vmem>>, %arg7: memref<1x128xf32, #tpu.memory_space<vmem>>, %arg8: memref<1x128xf32, #tpu.memory_space<vmem>>, %arg9: memref<1x1xf32, #tpu.memory_space<smem>>, %arg10: memref<1x128xf32, #tpu.memory_space<vmem>>) attributes {dimension_semantics = [#tpu.dimension_semantics<parallel>], iteration_bounds = array<i64: 1>, scalar_prefetch = 0 : i64, scratch_operands = 0 : i64, tpu.core_type = #tpu.core_type<tc>, window_params = [{transform_indices = @transform_0, window_bounds = array<i64: 128, 16>}, {transform_indices = @transform_1, window_bounds = array<i64: 128, 4>}, {pipeline_mode = #tpu.pipeline_mode<synchronous>, transform_indices = @transform_2, window_bounds = array<i64: 16, 128>}, {pipeline_mode = #tpu.pipeline_mode<synchronous>, transform_indices = @transform_3, window_bounds = array<i64: 1, 128>}, {pipeline_mode = #tpu.pipeline_mode<synchronous>, transform_indices = @transform_4, window_bounds = array<i64: 128, 128>}, {pipeline_mode = #tpu.pipeline_mode<synchronous>, transform_indices = @transform_5, window_bounds = array<i64: 4, 128>}, {pipeline_mode = #tpu.pipeline_mode<synchronous>, transform_indices = @transform_6, window_bounds = array<i64: 1, 128>}, {pipeline_mode = #tpu.pipeline_mode<synchronous>, transform_indices = @transform_7, window_bounds = array<i64: 1, 128>}, {transform_indices = @transform_8, window_bounds = array<i64: 1, 1>}, {transform_indices = @transform_9, window_bounds = array<i64: 1, 128>}]} {
    %c0 = arith.constant 0 : index
    %c0_0 = arith.constant 0 : index
    %0 = vector.load %arg1[%c0, %c0_0] : memref<128x16xf32, #tpu.memory_space<vmem>>, vector<128x16xf32>
    %1 = arith.truncf %0 : vector<128x16xf32> to vector<128x16xbf16>
    %c0_1 = arith.constant 0 : index
    %c0_2 = arith.constant 0 : index
    %2 = vector.load %arg3[%c0_1, %c0_2] : memref<16x128xbf16, #tpu.memory_space<vmem>>, vector<16x128xbf16>
    %cst = arith.constant dense<0.000000e+00> : vector<128x128xf32>
    %3 = tpu.matmul %1, %2, %cst {dimension_numbers = #tpu.dot_dimension_numbers<[1], [0], [0], [1], [0, 0, 1, 1], [], []>} : vector<128x16xbf16>, vector<16x128xbf16>, vector<128x128xf32> -> vector<128x128xf32>
    %c0_3 = arith.constant 0 : index
    %c0_4 = arith.constant 0 : index
    %4 = vector.load %arg4[%c0_3, %c0_4] : memref<1x128xf32, #tpu.memory_space<vmem>>, vector<1x128xf32>
    %5 = vector.broadcast %4 : vector<1x128xf32> to vector<128x128xf32>
    %6 = arith.addf %3, %5 : vector<128x128xf32>
    %cst_5 = arith.constant 0.000000e+00 : f32
    %7 = vector.broadcast %cst_5 : f32 to vector<128x128xf32>
    %8 = arith.maximumf %6, %7 : vector<128x128xf32>
    %9 = arith.truncf %8 : vector<128x128xf32> to vector<128x128xbf16>
    %c0_6 = arith.constant 0 : index
    %c0_7 = arith.constant 0 : index
    %10 = vector.load %arg5[%c0_6, %c0_7] : memref<128x128xbf16, #tpu.memory_space<vmem>>, vector<128x128xbf16>
    %cst_8 = arith.constant dense<0.000000e+00> : vector<128x128xf32>
    %11 = tpu.matmul %9, %10, %cst_8 {dimension_numbers = #tpu.dot_dimension_numbers<[1], [0], [0], [1], [0, 0, 1, 1], [], []>} : vector<128x128xbf16>, vector<128x128xbf16>, vector<128x128xf32> -> vector<128x128xf32>
    %c0_9 = arith.constant 0 : index
    %c0_10 = arith.constant 0 : index
    %12 = vector.load %arg2[%c0_9, %c0_10] : memref<128x4xf32, #tpu.memory_space<vmem>>, vector<128x4xf32>
    %13 = arith.truncf %12 : vector<128x4xf32> to vector<128x4xbf16>
    %c0_11 = arith.constant 0 : index
    %c0_12 = arith.constant 0 : index
    %14 = vector.load %arg6[%c0_11, %c0_12] : memref<4x128xbf16, #tpu.memory_space<vmem>>, vector<4x128xbf16>
    %cst_13 = arith.constant dense<0.000000e+00> : vector<128x128xf32>
    %15 = tpu.matmul %13, %14, %cst_13 {dimension_numbers = #tpu.dot_dimension_numbers<[1], [0], [0], [1], [0, 0, 1, 1], [], []>} : vector<128x4xbf16>, vector<4x128xbf16>, vector<128x128xf32> -> vector<128x128xf32>
    %16 = arith.addf %11, %15 : vector<128x128xf32>
    %c0_14 = arith.constant 0 : index
    %c0_15 = arith.constant 0 : index
    %17 = vector.load %arg7[%c0_14, %c0_15] : memref<1x128xf32, #tpu.memory_space<vmem>>, vector<1x128xf32>
    %18 = vector.broadcast %17 : vector<1x128xf32> to vector<128x128xf32>
    %19 = arith.addf %16, %18 : vector<128x128xf32>
    %cst_16 = arith.constant 0.000000e+00 : f32
    %20 = vector.broadcast %cst_16 : f32 to vector<128x128xf32>
    %21 = arith.maximumf %19, %20 : vector<128x128xf32>
    %c0_17 = arith.constant 0 : index
    %c0_18 = arith.constant 0 : index
    %22 = vector.load %arg8[%c0_17, %c0_18] : memref<1x128xf32, #tpu.memory_space<vmem>>, vector<1x128xf32>
    %23 = vector.broadcast %22 : vector<1x128xf32> to vector<128x128xf32>
    %24 = arith.mulf %21, %23 : vector<128x128xf32>
    %25 = vector.shape_cast %24 : vector<128x128xf32> to vector<1x128x128xf32>
    %26 = tpu.transpose %25, [0, 2, 1] : vector<1x128x128xf32> -> vector<1x128x128xf32>
    %cst_19 = arith.constant dense<0.000000e+00> : vector<1x128xf32>
    %27 = vector.multi_reduction <add>, %26, %cst_19 [1] : vector<1x128x128xf32> to vector<1x128xf32>
    %c0_20 = arith.constant 0 : index
    %c0_21 = arith.constant 0 : index
    %28 = memref.load %arg9[%c0_20, %c0_21] : memref<1x1xf32, #tpu.memory_space<smem>>
    %29 = vector.broadcast %28 : f32 to vector<1x128xf32>
    %30 = arith.addf %27, %29 : vector<1x128xf32>
    %c0_22 = arith.constant 0 : index
    %c0_23 = arith.constant 0 : index
    %31 = vector.load %arg10[%c0_22, %c0_23] : memref<1x128xf32, #tpu.memory_space<vmem>>, vector<1x128xf32>
    tpu.vector_store %arg10[%c0_22, %c0_23], %30 {strides = array<i32>} : memref<1x128xf32, #tpu.memory_space<vmem>>, vector<1x128xf32>,
    return
  }
  func.func @transform_0(%arg0: i32) -> (i32, i32) {
    %c0_i32 = arith.constant 0 : i32
    %c0_i32_0 = arith.constant 0 : i32
    return %arg0, %c0_i32 : i32, i32
  }
  func.func @transform_1(%arg0: i32) -> (i32, i32) {
    %c0_i32 = arith.constant 0 : i32
    %c0_i32_0 = arith.constant 0 : i32
    return %arg0, %c0_i32 : i32, i32
  }
  func.func @transform_2(%arg0: i32) -> (i32, i32) {
    %c0_i32 = arith.constant 0 : i32
    %c0_i32_0 = arith.constant 0 : i32
    %c0_i32_1 = arith.constant 0 : i32
    return %c0_i32, %c0_i32_0 : i32, i32
  }
  func.func @transform_3(%arg0: i32) -> (i32, i32) {
    %c0_i32 = arith.constant 0 : i32
    %c0_i32_0 = arith.constant 0 : i32
    %c0_i32_1 = arith.constant 0 : i32
    return %c0_i32, %c0_i32_0 : i32, i32
  }
  func.func @transform_4(%arg0: i32) -> (i32, i32) {
    %c0_i32 = arith.constant 0 : i32
    %c0_i32_0 = arith.constant 0 : i32
    %c0_i32_1 = arith.constant 0 : i32
    return %c0_i32, %c0_i32_0 : i32, i32
  }
  func.func @transform_5(%arg0: i32) -> (i32, i32) {
    %c0_i32 = arith.constant 0 : i32
    %c0_i32_0 = arith.constant 0 : i32
    %c0_i32_1 = arith.constant 0 : i32
    return %c0_i32, %c0_i32_0 : i32, i32
  }
  func.func @transform_6(%arg0: i32) -> (i32, i32) {
    %c0_i32 = arith.constant 0 : i32
    %c0_i32_0 = arith.constant 0 : i32
    %c0_i32_1 = arith.constant 0 : i32
    return %c0_i32, %c0_i32_0 : i32, i32
  }
  func.func @transform_7(%arg0: i32) -> (i32, i32) {
    %c0_i32 = arith.constant 0 : i32
    %c0_i32_0 = arith.constant 0 : i32
    %c0_i32_1 = arith.constant 0 : i32
    return %c0_i32, %c0_i32_0 : i32, i32
  }
  func.func @transform_8(%arg0: i32) -> (i32, i32) {
    %c0_i32 = arith.constant 0 : i32
    %c0_i32_0 = arith.constant 0 : i32
    %c0_i32_1 = arith.constant 0 : i32
    return %c0_i32, %c0_i32_0 : i32, i32
  }
  func.func @transform_9(%arg0: i32) -> (i32, i32) {
    %c0_i32 = arith.constant 0 : i32
    %c0_i32_0 = arith.constant 0 : i32
    return %arg0, %c0_i32 : i32, i32
  }
}

</mosaic_0001>

<bundles_post_ra>
// kernel: critic_forward.1
= control target key start
LH: loop header
LB: loop body
LE: loop exit
PB: predicated region body
PF: predicated region fallthrough
CT: control target
= control target key end

     0   :  { %vm73_vm0 = vcmask 130048   ;;  %vm285_vm1 = vcmask 1041408   ;;  %vm260_vm2 = vcmask 31744   ;;  %s1069_s2 = inlined_call_operand.vmem [shape: bf16[16,128], index: 2, kind: input, shape index: {}]   ;;  %s1070_s0 = inlined_call_operand.vmem [shape: f32[128,16], index: 0, kind: input, shape index: {}]   ;;  %s1071_s4 = inlined_call_operand.vmem [shape: bf16[128,128], index: 4, kind: input, shape index: {}]   ;;  %s1072_s5 = inlined_call_operand.vmem [shape: bf16[4,128], index: 5, kind: input, shape index: {}]   ;;  %s1073_s1 = inlined_call_operand.vmem [shape: f32[128,4], index: 1, kind: input, shape index: {}]   ;;  %s1074_s3 = inlined_call_operand.vmem [shape: f32[1,128], index: 3, kind: input, shape index: {}]   ;;  %s1075_s6 = inlined_call_operand.vmem [shape: f32[1,128], index: 6, kind: input, shape index: {}]   ;;  %s1076_s7 = inlined_call_operand.vmem [shape: f32[1,128], index: 7, kind: input, shape index: {}]   ;;  %s1077_s8 = inlined_call_operand.<no memory space> [shape: f32[1,1], index: 8, kind: input, shape index: {}]   ;;  %s1078_s9 = inlined_call_operand.vmem [shape: f32[1,128], index: 9, kind: output, shape index: {}]  }
   0x1   :  { %v817_v0 = vld [vmem:[%s1069_s2] sm:$0xff]   ;;  %v35_v2 = vld [vmem:[%s1070_s0 + $0x8] sm:$0xff]  ;;  %v36_v3 = vld [vmem:[%s1070_s0 + $0x10] sm:$0xff] }
   0x2   :  { %v34_v1 = vld [vmem:[%s1070_s0] sm:$0xff]  ;;  %716 = vmatprep.subr.bf16.mxu0 %v817_v0  ;;  %v37_v5 = vld [vmem:[%s1070_s0 + $0x18] sm:$0xff]  ;;  %v39_v7 = vld [vmem:[%s1070_s0 + $0x28] sm:$0xff] }
   0x3   :  { %v50_v4 = vpack.c.bf16 %v35_v2, %v34_v1  ;;  %v38_v6 = vld [vmem:[%s1070_s0 + $0x20] sm:$0xff]  ;;  %717 = vmatpush3.bf16.msra.mxu0 %v817_v0  ;;  %v51_v8 = vpack.c.bf16 %v37_v5, %v36_v3  ;;  %v40_v10 = vld [vmem:[%s1070_s0 + $0x30] sm:$0xff]  ;;  %v41_v11 = vld [vmem:[%s1070_s0 + $0x38] sm:$0xff] }
   0x4   :  { %v52_v9 = vpack.c.bf16 %v39_v7, %v38_v6  ;;  %v42_v12 = vld [vmem:[%s1070_s0 + $0x40] sm:$0xff]  ;;  %v43_v13 = vld [vmem:[%s1070_s0 + $0x48] sm:$0xff]  ;;  %v53_v16 = vpack.c.bf16 %v41_v11, %v40_v10  ;;  %v820_v22 = vld [vmem:[%s1071_s4 + $0x10] sm:$0xff]  }
   0x5   :  { %718 = vmatprep.mubr.msk.bf16.mxu0 %vm73_vm0, %v50_v4  ;;  %v818_v14 = vld [vmem:[%s1071_s4] sm:$0xff]   ;;  %v819_v15 = vld [vmem:[%s1071_s4 + $0x8] sm:$0xff]   ;;  %v54_v19 = vpack.c.bf16 %v43_v13, %v42_v12  ;;  %v237_v24 = vld [vmem:[%s1073_s1 + $0x10] sm:$0xff] }
   0x6   :  { %719 = vmatmul.mubr.msk.bf16.vlgmr.msra.gmra.mrb[0].mxu0 %vm73_vm0, %v51_v8  ;;  %752 = vmatprep.subr.bf16.mxu0 %v818_v14  ;;  %v259_v17 = vld [vmem:[%s1072_s5] sm:$0x3]  ;;  %v236_v21 = vld [vmem:[%s1073_s1 + $0x8] sm:$0xff]  ;;  %v238_v25 = vld [vmem:[%s1073_s1 + $0x18] sm:$0xff] }
   0x7   :  { %722 = vmatprep.mubr.msk.bf16.mxu0 %vm73_vm0, %v52_v9  ;;  %753 = vmatpush3.bf16.msra.mxu0 %v818_v14  ;;  %v235_v18 = vld [vmem:[%s1073_s1] sm:$0xff]  ;;  %v287_v20 = vsel %vm285_vm1, %v259_v17, 0  ;;  %v252_v26 = vpack.c.bf16 %v238_v25, %v237_v24  ;;  %v44_v27 = vld [vmem:[%s1070_s0 + $0x50] sm:$0xff]  ;;  %v45_v28 = vld [vmem:[%s1070_s0 + $0x58] sm:$0xff] }
   0x8   :  { %754 = vmatprep.subr.bf16.mxu0 %v819_v15  ;;  %816 = vmatprep.subr.msk.bf16.mxu1 %vm285_vm1, %v259_v17  ;;  %v251_v23 = vpack.c.bf16 %v236_v21, %v235_v18  ;;  %v46_v29 = vld [vmem:[%s1070_s0 + $0x60] sm:$0xff]  ;;  %v47_v30 = vld [vmem:[%s1070_s0 + $0x68] sm:$0xff]  ;;  %v821_v31 = vld [vmem:[%s1071_s4 + $0x18] sm:$0xff]   ;;  %v55_v32 = vpack.c.bf16 %v45_v28, %v44_v27 }
   0x9   :  { %735 = vmatpush3.bf16.msra.mxu1 %v287_v20  ;;  %v56_v33 = vpack.c.bf16 %v47_v30, %v46_v29  ;;  %v822_v34 = vld [vmem:[%s1071_s4 + $0x20] sm:$0xff]   ;;  %v48_v35 = vld [vmem:[%s1070_s0 + $0x70] sm:$0xff]  ;;  %v49_v36 = vld [vmem:[%s1070_s0 + $0x78] sm:$0xff] }
   0xa   :  { %784 = vmatprep.subr.bf16.mxu1 %v818_v14  ;;  %736 = vmatprep.mubr.msk.bf16.mxu1 %vm260_vm2, %v251_v23  ;;  %v823_v37 = vld [vmem:[%s1071_s4 + $0x28] sm:$0xff]   ;;  %v57_v38 = vpack.c.bf16 %v49_v36, %v48_v35  ;;  %v239_v39 = vld [vmem:[%s1073_s1 + $0x20] sm:$0xff]  ;;  %v241_v42 = vld [vmem:[%s1073_s1 + $0x30] sm:$0xff] }
   0xb   :  { %755 = vmatpush3.bf16.msra.mxu0 %v819_v15  ;;  %v240_v40 = vld [vmem:[%s1073_s1 + $0x28] sm:$0xff]  ;;  %v242_v43 = vld [vmem:[%s1073_s1 + $0x38] sm:$0xff]  ;;  %v824_v44 = vld [vmem:[%s1071_s4 + $0x30] sm:$0xff]  }
   0xc   :  { %756 = vmatprep.subr.bf16.mxu0 %v820_v22  ;;  %737 = vmatmul.mubr.msk.bf16.vlgmr.msra.gmra.mrb[0].mxu1 %vm260_vm2, %v252_v26  ;;  %v253_v41 = vpack.c.bf16 %v240_v40, %v239_v39  ;;  %v254_v45 = vpack.c.bf16 %v242_v43, %v241_v42  ;;  %v825_v46 = vld [vmem:[%s1071_s4 + $0x38] sm:$0xff]   ;;  %v243_v47 = vld [vmem:[%s1073_s1 + $0x40] sm:$0xff]  ;;  %v244_v48 = vld [vmem:[%s1073_s1 + $0x48] sm:$0xff] }
   0xd   :  { %792 = vmatpush3.bf16.msra.mxu1 %v818_v14  ;;  %v255_v49 = vpack.c.bf16 %v244_v48, %v243_v47  ;;  %v245_v50 = vld [vmem:[%s1073_s1 + $0x50] sm:$0xff]  ;;  %v246_v51 = vld [vmem:[%s1073_s1 + $0x58] sm:$0xff]  ;;  %v247_v53 = vld [vmem:[%s1073_s1 + $0x60] sm:$0xff] }
   0xe   :  { %723 = vmatmul.mubr.msk.bf16.gmra.mrb[4].mxu0 %vm73_vm0, %v53_v16  ;;  %785 = vmatprep.subr.bf16.mxu1 %v819_v15  ;;  %v256_v52 = vpack.c.bf16 %v246_v51, %v245_v50  ;;  %v248_v54 = vld [vmem:[%s1073_s1 + $0x68] sm:$0xff]  ;;  %v249_v56 = vld [vmem:[%s1073_s1 + $0x70] sm:$0xff]  ;;  %v250_v57 = vld [vmem:[%s1073_s1 + $0x78] sm:$0xff] }
   0xf   :  { %726 = vmatprep.mubr.msk.bf16.mxu0 %vm73_vm0, %v54_v19  ;;  %757 = vmatpush3.bf16.msra.mxu0 %v820_v22  ;;  %v257_v55 = vpack.c.bf16 %v248_v54, %v247_v53  ;;  %v258_v58 = vpack.c.bf16 %v250_v57, %v249_v56  ;;  %v654_v59 = vld [vmem:[%s1074_s3] ss:$0 sm:$0xff] }
  0x10   :  { %758 = vmatprep.subr.bf16.mxu0 %v821_v31  ;;  %740 = vmatprep.mubr.msk.bf16.mxu1 %vm260_vm2, %v253_v41 }
  0x11   :  { %793 = vmatpush3.bf16.msra.mxu1 %v819_v15 }
  0x12   :  { %786 = vmatprep.subr.bf16.mxu1 %v820_v22 }
  0x13   :  { %759 = vmatpush3.bf16.msra.mxu0 %v821_v31 }
  0x14   :  { %760 = vmatprep.subr.bf16.mxu0 %v822_v34  ;;  %741 = vmatmul.mubr.msk.bf16.gmra.mrb[4].mxu1 %vm260_vm2, %v254_v45 }
  0x15   :  { %794 = vmatpush3.bf16.msra.mxu1 %v820_v22  ;;  %744 = vmatprep.mubr.msk.bf16.mxu1 %vm260_vm2, %v255_v49 }
  0x16   :  { %727 = vmatmul.mubr.msk.bf16.gmra.mrb[8].mxu0 %vm73_vm0, %v55_v32  ;;  %787 = vmatprep.subr.bf16.mxu1 %v821_v31 }
  0x17   :  { %730 = vmatprep.mubr.msk.bf16.mxu0 %vm73_vm0, %v56_v33  ;;  %761 = vmatpush3.bf16.msra.mxu0 %v822_v34 }
  0x18   :  { %762 = vmatprep.subr.bf16.mxu0 %v823_v37 }
  0x19   :  { %795 = vmatpush3.bf16.msra.mxu1 %v821_v31 }
  0x1a   :  { %788 = vmatprep.subr.bf16.mxu1 %v822_v34 }
  0x1b   :  { %763 = vmatpush3.bf16.msra.mxu0 %v823_v37 }
  0x1c   :  { %764 = vmatprep.subr.bf16.mxu0 %v824_v44  ;;  %745 = vmatmul.mubr.msk.bf16.gmra.mrb[8].mxu1 %vm260_vm2, %v256_v52 }
  0x1d   :  { %796 = vmatpush3.bf16.msra.mxu1 %v822_v34  ;;  %748 = vmatprep.mubr.msk.bf16.mxu1 %vm260_vm2, %v257_v55 }
  0x1e   :  { %731 = vmatmul.mubr.msk.bf16.gmra.mrb[12].mxu0 %vm73_vm0, %v57_v38  ;;  %789 = vmatprep.subr.bf16.mxu1 %v823_v37 }
  0x1f   :  { %765 = vmatpush3.bf16.msra.mxu0 %v824_v44 }
  0x20   :  { %766 = vmatprep.subr.bf16.mxu0 %v825_v46 }
  0x21   :  { %797 = vmatpush3.bf16.msra.mxu1 %v823_v37 }
  0x22   :  { %790 = vmatprep.subr.bf16.mxu1 %v824_v44 }
  0x23   :  { %767 = vmatpush3.bf16.msra.mxu0 %v825_v46 }
  0x24   :  { %749 = vmatmul.mubr.msk.bf16.gmra.mrb[12].mxu1 %vm260_vm2, %v258_v58 }
  0x25   :  { %798 = vmatpush3.bf16.msra.mxu1 %v824_v44 }
  0x26   :  { %791 = vmatprep.subr.bf16.mxu1 %v825_v46 }
  0x29   :  { %799 = vmatpush3.bf16.msra.mxu1 %v825_v46 }
  0xd9   :  { %v720_v60 = vpop.f32.mrb[0].mxu0 }
  0xda   :  { %v141_v61 = vadd.f32 %v720_v60, %v654_v59  ;;  %v132_v62 = vpop.f32.mrb[1].mxu0 }
  0xdb   :  { %v133_v63 = vadd.f32 %v654_v59, %v132_v62  ;;  %v721_v0 = vpop.f32.mrb[2].mxu0 }
  0xdc   :  { %v144_v1 = vadd.f32 %v721_v0, %v654_v59  ;;  %v135_v2 = vpop.f32.mrb[3].mxu0  ;;  %v197_v4 = vmax.f32 %v141_v61, 0.0 }
  0xdd   :  { %v136_v3 = vadd.f32 %v654_v59, %v135_v2  ;;  %v195_v6 = vmax.f32 %v133_v63, 0.0  ;;  %v1024_v63 = vld [vmem:[%s1075_s6] ss:$0 sm:$0xff] }
  0xde   :  { %v198_v5 = vmax.f32 %v144_v1, 0.0 }
  0xdf   :  { %v196_v7 = vmax.f32 %v136_v3, 0.0  ;;  %v738_v15 = vpop.f32.mrb[0].mxu1 }
  0xe0   :  { %v212_v8 = vpack.c.bf16 %v198_v5, %v197_v4  ;;  %v323_v19 = vpop.f32.mrb[1].mxu1 }
  0xe1   :  { %v211_v9 = vpack.c.bf16 %v196_v7, %v195_v6  ;;  %v724_v10 = vpop.f32.mrb[4].mxu0  ;;  %v739_v22 = vpop.f32.mrb[2].mxu1  ;;  %v1030_v6 = vld [vmem:[%s1076_s7] ss:$0 sm:$0xff] }
  0xe2   :  { %v157_v11 = vadd.f32 %v724_v10, %v654_v59  ;;  %v148_v12 = vpop.f32.mrb[5].mxu0  ;;  %v326_v24 = vpop.f32.mrb[3].mxu1 }
  0xe3   :  { %v149_v13 = vadd.f32 %v654_v59, %v148_v12  ;;  %v725_v14 = vpop.f32.mrb[6].mxu0  ;;  %768 = vmatprep.mubr.bf16.mxu0 %v211_v9 }
  0xe4   :  { %v201_v16 = vmax.f32 %v157_v11, 0.0  ;;  %v160_v17 = vadd.f32 %v725_v14, %v654_v59  ;;  %v151_v18 = vpop.f32.mrb[7].mxu0  ;;  %769 = vmatmul.mubr.bf16.vlgmr.msra.gmra.mrb[16].mxu0 %v212_v8 }
  0xe5   :  { %v199_v20 = vmax.f32 %v149_v13, 0.0  ;;  %v152_v21 = vadd.f32 %v654_v59, %v151_v18 }
  0xe6   :  { %v202_v23 = vmax.f32 %v160_v17, 0.0 }
  0xe7   :  { %v200_v25 = vmax.f32 %v152_v21, 0.0  ;;  %v742_v56 = vpop.f32.mrb[4].mxu1 }
  0xe8   :  { %v214_v26 = vpack.c.bf16 %v202_v23, %v201_v16  ;;  %v339_v57 = vpop.f32.mrb[5].mxu1 }
  0xe9   :  { %v213_v27 = vpack.c.bf16 %v200_v25, %v199_v20  ;;  %v728_v28 = vpop.f32.mrb[8].mxu0  ;;  %v743_v58 = vpop.f32.mrb[6].mxu1 }
  0xea   :  { %v173_v29 = vadd.f32 %v728_v28, %v654_v59  ;;  %v164_v30 = vpop.f32.mrb[9].mxu0  ;;  %v342_v60 = vpop.f32.mrb[7].mxu1 }
  0xeb   :  { %v165_v31 = vadd.f32 %v654_v59, %v164_v30  ;;  %v729_v32 = vpop.f32.mrb[10].mxu0  ;;  %772 = vmatprep.mubr.bf16.mxu0 %v213_v27 }
  0xec   :  { %v205_v33 = vmax.f32 %v173_v29, 0.0  ;;  %v176_v34 = vadd.f32 %v729_v32, %v654_v59  ;;  %v167_v35 = vpop.f32.mrb[11].mxu0  ;;  %773 = vmatmul.mubr.bf16.gmra.mrb[20].mxu0 %v214_v26 }
  0xed   :  { %v203_v36 = vmax.f32 %v165_v31, 0.0  ;;  %v168_v37 = vadd.f32 %v654_v59, %v167_v35 }
  0xee   :  { %v206_v38 = vmax.f32 %v176_v34, 0.0 }
  0xef   :  { %v204_v39 = vmax.f32 %v168_v37, 0.0 }
  0xf0   :  { %v216_v40 = vpack.c.bf16 %v206_v38, %v205_v33 }
  0xf1   :  { %v215_v41 = vpack.c.bf16 %v204_v39, %v203_v36  ;;  %v732_v42 = vpop.f32.mrb[12].mxu0 }
  0xf2   :  { %v189_v43 = vadd.f32 %v732_v42, %v654_v59  ;;  %v180_v44 = vpop.f32.mrb[13].mxu0 }
  0xf3   :  { %v181_v45 = vadd.f32 %v654_v59, %v180_v44  ;;  %v733_v46 = vpop.f32.mrb[14].mxu0  ;;  %776 = vmatprep.mubr.bf16.mxu1 %v215_v41 }
  0xf4   :  { %v209_v47 = vmax.f32 %v189_v43, 0.0  ;;  %v192_v48 = vadd.f32 %v733_v46, %v654_v59  ;;  %v183_v49 = vpop.f32.mrb[15].mxu0  ;;  %777 = vmatmul.mubr.bf16.vlgmr.msra.gmra.mrb[8].mxu1 %v216_v40 }
  0xf5   :  { %v207_v50 = vmax.f32 %v181_v45, 0.0  ;;  %v184_v51 = vadd.f32 %v654_v59, %v183_v49 }
  0xf6   :  { %v210_v52 = vmax.f32 %v192_v48, 0.0 }
  0xf7   :  { %v208_v53 = vmax.f32 %v184_v51, 0.0 }
  0xf8   :  { %v218_v54 = vpack.c.bf16 %v210_v52, %v209_v47 }
  0xf9   :  { %v217_v55 = vpack.c.bf16 %v208_v53, %v207_v50 }
  0xfb   :  { %780 = vmatprep.mubr.bf16.mxu1 %v217_v55 }
  0xfc   :  { %781 = vmatmul.mubr.bf16.gmra.mrb[12].mxu1 %v218_v54 }
 0x1b7   :  { %v770_v61 = vpop.f32.mrb[16].mxu0 }
 0x1b8   :  { %v477_v62 = vadd.f32 %v770_v61, %v738_v15  ;;  %v468_v0 = vpop.f32.mrb[17].mxu0 }
 0x1b9   :  { %v469_v1 = vadd.f32 %v468_v0, %v323_v19  ;;  %v771_v59 = vpop.f32.mrb[18].mxu0 }
 0x1ba   :  { %v480_v2 = vadd.f32 %v771_v59, %v739_v22  ;;  %v471_v3 = vpop.f32.mrb[19].mxu0  ;;  %v540_v9 = vadd.f32 %v1024_v63, %v477_v62 }
 0x1bb   :  { %v472_v4 = vadd.f32 %v471_v3, %v326_v24  ;;  %v538_v5 = vadd.f32 %v1024_v63, %v469_v1 }
 0x1bc   :  { %v556_v19 = vmax.f32 %v540_v9, 0.0  ;;  %v541_v20 = vadd.f32 %v1024_v63, %v480_v2 }
 0x1bd   :  { %v539_v7 = vadd.f32 %v1024_v63, %v472_v4  ;;  %v554_v8 = vmax.f32 %v538_v5, 0.0 }
 0x1be   :  { %v557_v23 = vmax.f32 %v541_v20, 0.0  ;;  %v579_v26 = vmul.f32 %v1030_v6, %v556_v19 }
 0x1bf   :  { %v555_v10 = vmax.f32 %v539_v7, 0.0  ;;  %v774_v11 = vpop.f32.mrb[20].mxu0  ;;  %v577_v12 = vmul.f32 %v1030_v6, %v554_v8 }
 0x1c0   :  { %v493_v13 = vadd.f32 %v774_v11, %v742_v56  ;;  %v484_v14 = vpop.f32.mrb[21].mxu0  ;;  %v580_v32 = vmul.f32 %v1030_v6, %v557_v23 }
 0x1c1   :  { %v485_v15 = vadd.f32 %v484_v14, %v339_v57  ;;  %v775_v16 = vpop.f32.mrb[22].mxu0  ;;  %593 = vxpose.xlu0.b32.start [1/16] %v577_v12, 128  ;;  %v578_v22 = vmul.f32 %v1030_v6, %v555_v10 }
 0x1c2   :  { %v496_v17 = vadd.f32 %v775_v16, %v743_v58  ;;  %v487_v18 = vpop.f32.mrb[23].mxu0  ;;  %v544_v33 = vadd.f32 %v1024_v63, %v493_v13 }
 0x1c3   :  { %v488_v21 = vadd.f32 %v487_v18, %v342_v60  ;;  %v542_v24 = vadd.f32 %v1024_v63, %v485_v15 }
 0x1c4   :  { %v560_v40 = vmax.f32 %v544_v33, 0.0  ;;  %v545_v41 = vadd.f32 %v1024_v63, %v496_v17 }
 0x1c5   :  { %594 = vxpose.xlu0.b32.cont [2/16] %v578_v22, 128  ;;  %v558_v30 = vmax.f32 %v542_v24, 0.0  ;;  %v543_v31 = vadd.f32 %v1024_v63, %v488_v21 }
 0x1c6   :  { %v561_v43 = vmax.f32 %v545_v41, 0.0  ;;  %v583_v45 = vmul.f32 %v1030_v6, %v560_v40 }
 0x1c7   :  { %v778_v25 = vpop.f32.mrb[8].mxu1  ;;  %v559_v34 = vmax.f32 %v543_v31, 0.0  ;;  %v581_v36 = vmul.f32 %v1030_v6, %v558_v30 }
 0x1c8   :  { %v500_v27 = vpop.f32.mrb[9].mxu1  ;;  %v584_v48 = vmul.f32 %v1030_v6, %v561_v43  ;;  %v548_v49 = vadd.f32 %v778_v25, %v1024_v63 }
 0x1c9   :  { %v779_v28 = vpop.f32.mrb[10].mxu1  ;;  %595 = vxpose.xlu0.b32.cont [3/16] %v579_v26, 128  ;;  %v582_v42 = vmul.f32 %v1030_v6, %v559_v34  ;;  %v546_v44 = vadd.f32 %v1024_v63, %v500_v27 }
 0x1ca   :  { %v503_v29 = vpop.f32.mrb[11].mxu1  ;;  %v564_v52 = vmax.f32 %v548_v49, 0.0  ;;  %v549_v53 = vadd.f32 %v779_v28, %v1024_v63 }
 0x1cb   :  { %v562_v46 = vmax.f32 %v546_v44, 0.0  ;;  %v547_v47 = vadd.f32 %v1024_v63, %v503_v29 }
 0x1cc   :  { %v565_v55 = vmax.f32 %v549_v53, 0.0  ;;  %v587_v57 = vmul.f32 %v1030_v6, %v564_v52 }
 0x1cd   :  { %596 = vxpose.xlu0.b32.cont [4/16] %v580_v32, 128  ;;  %v563_v50 = vmax.f32 %v547_v47, 0.0  ;;  %v585_v51 = vmul.f32 %v1030_v6, %v562_v46 }
 0x1ce   :  { %v588_v61 = vmul.f32 %v1030_v6, %v565_v55 }
 0x1cf   :  { %v782_v35 = vpop.f32.mrb[12].mxu1  ;;  %v586_v54 = vmul.f32 %v1030_v6, %v563_v50 }
 0x1d0   :  { %v516_v37 = vpop.f32.mrb[13].mxu1  ;;  %v552_v62 = vadd.f32 %v782_v35, %v1024_v63 }
 0x1d1   :  { %v783_v38 = vpop.f32.mrb[14].mxu1  ;;  %597 = vxpose.xlu0.b32.cont [5/16] %v581_v36, 128  ;;  %v550_v56 = vadd.f32 %v1024_v63, %v516_v37 }
 0x1d2   :  { %v519_v39 = vpop.f32.mrb[15].mxu1  ;;  %v568_v59 = vmax.f32 %v552_v62, 0.0  ;;  %v553_v2 = vadd.f32 %v783_v38, %v1024_v63 }
 0x1d3   :  { %v566_v58 = vmax.f32 %v550_v56, 0.0  ;;  %v551_v60 = vadd.f32 %v1024_v63, %v519_v39 }
 0x1d4   :  { %v569_v4 = vmax.f32 %v553_v2, 0.0  ;;  %v591_v5 = vmul.f32 %v1030_v6, %v568_v59 }
 0x1d5   :  { %598 = vxpose.xlu0.b32.cont [6/16] %v582_v42, 128  ;;  %v567_v0 = vmax.f32 %v551_v60, 0.0  ;;  %v589_v1 = vmul.f32 %v1030_v6, %v566_v58  ;;  %v647_v42 = vstv %s1077_s8 }
 0x1d6   :  { %v592_v7 = vmul.f32 %v1030_v6, %v569_v4 }
 0x1d7   :  { %v590_v3 = vmul.f32 %v1030_v6, %v567_v0 }
 0x1d9   :  { %599 = vxpose.xlu0.b32.cont [7/16] %v583_v45, 128 }
 0x1dd   :  { %600 = vxpose.xlu0.b32.cont [8/16] %v584_v48, 128 }
 0x1e1   :  { %601 = vxpose.xlu0.b32.cont [9/16] %v585_v51, 128 }
 0x1e5   :  { %602 = vxpose.xlu0.b32.cont [10/16] %v586_v54, 128 }
 0x1e9   :  { %603 = vxpose.xlu0.b32.cont [11/16] %v587_v57, 128 }
 0x1ed   :  { %604 = vxpose.xlu0.b32.cont [12/16] %v588_v61, 128 }
 0x1f1   :  { %605 = vxpose.xlu0.b32.cont [13/16] %v589_v1, 128 }
 0x1f5   :  { %606 = vxpose.xlu0.b32.cont [14/16] %v590_v3, 128 }
 0x1f9   :  { %607 = vxpose.xlu0.b32.cont [15/16] %v591_v5, 128 }
 0x1fd   :  { %608 = vxpose.xlu0.b32.end [16/16] %v592_v7, 128 }
 0x241   :  { %v609_v8 = vpop.trf.xlu0 }
 0x245   :  { %v610_v9 = vpop.trf.xlu0 }
 0x246   :  { %v625_v63 = vadd.f32 %v610_v9, %v609_v8 }
 0x249   :  { %v611_v10 = vpop.trf.xlu0 }
 0x24a   :  { %v626_v17 = vadd.f32 %v625_v63, %v611_v10 }
 0x24d   :  { %v612_v11 = vpop.trf.xlu0 }
 0x24e   :  { %v627_v19 = vadd.f32 %v626_v17, %v612_v11 }
 0x251   :  { %v613_v12 = vpop.trf.xlu0 }
 0x252   :  { %v628_v20 = vadd.f32 %v627_v19, %v613_v12 }
 0x255   :  { %v614_v13 = vpop.trf.xlu0 }
 0x256   :  { %v629_v22 = vadd.f32 %v628_v20, %v614_v13 }
 0x259   :  { %v615_v14 = vpop.trf.xlu0 }
 0x25a   :  { %v630_v23 = vadd.f32 %v629_v22, %v615_v14 }
 0x25d   :  { %v616_v15 = vpop.trf.xlu0 }
 0x25e   :  { %v631_v6 = vadd.f32 %v630_v23, %v616_v15 }
 0x261   :  { %v617_v16 = vpop.trf.xlu0 }
 0x262   :  { %v632_v25 = vadd.f32 %v631_v6, %v617_v16 }
 0x265   :  { %v618_v18 = vpop.trf.xlu0 }
 0x266   :  { %v633_v27 = vadd.f32 %v632_v25, %v618_v18 }
 0x269   :  { %v619_v21 = vpop.trf.xlu0 }
 0x26a   :  { %v634_v28 = vadd.f32 %v633_v27, %v619_v21 }
 0x26d   :  { %v620_v24 = vpop.trf.xlu0 }
 0x26e   :  { %v635_v30 = vadd.f32 %v634_v28, %v620_v24 }
 0x271   :  { %v621_v26 = vpop.trf.xlu0 }
 0x272   :  { %v636_v31 = vadd.f32 %v635_v30, %v621_v26 }
 0x275   :  { %v622_v29 = vpop.trf.xlu0 }
 0x276   :  { %v637_v33 = vadd.f32 %v636_v31, %v622_v29 }
 0x279   :  { %v623_v32 = vpop.trf.xlu0 }
 0x27a   :  { %v638_v34 = vadd.f32 %v637_v33, %v623_v32 }
 0x27d   :  { %v624_v35 = vpop.trf.xlu0 }
 0x27e   :  { %v639_v36 = vadd.f32 %v638_v34, %v624_v35 }
 0x280   :  { %v640_v37 = vrot.slane %v639_v36, 4 }
 0x282   :  { %v641_v38 = vadd.f32 %v640_v37, %v639_v36 }
 0x284   :  { %v642_v39 = vrot.slane %v641_v38, 2 }
 0x286   :  { %v643_v40 = vadd.f32 %v642_v39, %v641_v38 }
 0x288   :  { %v644_v41 = vrot.slane %v643_v40, 1 }
 0x28a   :  { %v645_v43 = vadd.f32 %v644_v41, %v643_v40 }
 0x28c   :  { %v648_v44 = vadd.f32 %v647_v42, %v645_v43 }
 0x28e   :  { %649 = vst [vmem:[%s1078_s9] sm:$0x1] %v648_v44 }

</bundles_post_ra>
